<compile_context>
chip_gen: v5e
topology: v5e:2x2
jax: 0.10.0
libtpu: 0.0.40
codegen_flags: <defaults>
</compile_context>

<pallas_src>
import jax
import jax.numpy as jnp
from jax.experimental import pallas as pl
from jax.experimental.pallas import tpu as pltpu


_CHUNK = 32  # rows per inner-loop iteration (multiple of 8)


def _round_up(x, m):
    return ((x + m - 1) // m) * m


def _round_down(x, m):
    return (x // m) * m


def _vmem_budget_bytes():
    """Generation-aware usable-VMEM budget (capped below physical capacity)."""
    try:
        cap = int(pltpu.get_tpu_info().vmem_capacity_bytes)
    except Exception:
        cap = 64 << 20  # conservative (v7x-sized) fallback if the query fails
    # v7x (64 MiB physical)  -> ~48 MiB usable
    # v5e/v6e (128 MiB)      -> capped at 80 MiB usable
    return min(cap * 3 // 4, 80 << 20)


def _make_l1_block_kernel(br, cols, steps, rem_rows):
    """Kernel computing one (8, cols) per-lane partial sum of |a - b| per block."""
    groups = br // _CHUNK
    has_tail = rem_rows != 0  # static: does the last block have invalid rows?

    def block_sum(a_ref, b_ref, valid_rows=None):
        def body(g, acc):
            r = pl.multiple_of(g * _CHUNK, _CHUNK)
            av = a_ref[pl.ds(r, _CHUNK), :].astype(jnp.float32)
            bv = b_ref[pl.ds(r, _CHUNK), :].astype(jnp.float32)
            d = jnp.abs(av - bv)
            if valid_rows is not None:
                # Only the tail block pays for this mask (guarded by pl.when).
                row = jax.lax.broadcasted_iota(jnp.int32, (_CHUNK, cols), 0) + r
                d = jnp.where(row < valid_rows, d, 0.0)
            # Fold the 32-row chunk into the (8, cols) accumulator with
            # vreg-aligned static slices -> pure VPU adds, no XLU reduce.
            for k in range(_CHUNK // 8):
                acc = acc + d[k * 8:(k + 1) * 8, :]
            return acc

        return jax.lax.fori_loop(0, groups, body,
                                 jnp.zeros((8, cols), jnp.float32))

    def kernel(a_ref, b_ref, o_ref):
        if not has_tail:
            o_ref[...] = block_sum(a_ref, b_ref)
        else:
            is_tail = pl.program_id(0) == steps - 1

            @pl.when(jnp.logical_not(is_tail))
            def _():
                o_ref[...] = block_sum(a_ref, b_ref)

            @pl.when(is_tail)
            def _():
                o_ref[...] = block_sum(a_ref, b_ref, valid_rows=rem_rows)

    return kernel


def l1_loss_pallas(a, b):
    """mean(|a - b|) computed in a Pallas kernel (reduction='mean', like nn.L1Loss)."""
    assert a.shape == b.shape, "L1Loss requires matching shapes (no broadcasting here)"
    n_total = a.size
    assert n_total > 0
    itemsize = jnp.dtype(a.dtype).itemsize

    # --- lane-dense view of the inputs (no copy in the common case) ----------
    flat_a = a.reshape(-1)
    flat_b = b.reshape(-1)
    cols = None
    for c in (512, 256, 128):
        if n_total % c == 0:
            cols = c
            break
    if cols is None:
        # Rare fallback for sizes not divisible by 128: pad with zeros
        # (|0 - 0| = 0, so the mean over n_total stays exact).
        # TODO(synk): non-128-aligned sizes still pay one pad copy.
        cols = 128
        padded = _round_up(n_total, cols)
        flat_a = jnp.pad(flat_a, (0, padded - n_total))
        flat_b = jnp.pad(flat_b, (0, padded - n_total))
    rows = flat_a.size // cols
    a2 = flat_a.reshape(rows, cols)
    b2 = flat_b.reshape(rows, cols)

    # --- generation-aware block sizing ---------------------------------------
    vmem_budget = _vmem_budget_bytes()
    # 2 inputs x 2 pipeline buffers of (br, cols) + outputs + margin must fit.
    block_budget = min((vmem_budget - (6 << 20)) // 4, 16 << 20)
    br_cap = max(_CHUNK, _round_down(block_budget // (cols * itemsize), _CHUNK))
    br = min(br_cap, _round_up(rows, _CHUNK))
    steps = pl.cdiv(rows, br)
    rem_rows = rows - (steps - 1) * br
    if rem_rows == br:
        rem_rows = 0  # rows divide evenly -> no tail masking needed

    block_bytes = br * cols * itemsize
    vmem_limit = int(min(max(4 * block_bytes + (6 << 20), 16 << 20), vmem_budget))

    cost = pl.CostEstimate(
        flops=3 * rows * cols,
        transcendentals=0,
        bytes_accessed=int(2 * rows * cols * itemsize + steps * 8 * cols * 4),
    )

    kernel = _make_l1_block_kernel(br, cols, steps, rem_rows)

    partials = pl.pallas_call(
        kernel,
        out_shape=jax.ShapeDtypeStruct((steps * 8, cols), jnp.float32),
        grid_spec=pltpu.PrefetchScalarGridSpec(
            num_scalar_prefetch=0,
            grid=(steps,),
            in_specs=[pl.BlockSpec((br, cols), lambda i: (i, 0)),
                      pl.BlockSpec((br, cols), lambda i: (i, 0))],
            out_specs=pl.BlockSpec((8, cols), lambda i: (i, 0)),
        ),
        compiler_params=pltpu.CompilerParams(
            dimension_semantics=("parallel",),
            vmem_limit_bytes=vmem_limit,
        ),
        cost_estimate=cost,
    )(a2, b2)

    # Tiny final cross-lane / cross-block reduce + divide-by-N in the wrapper.
    return jnp.sum(partials) / jnp.float32(n_total)


class BetweenLossPallas:
    """JAX/Pallas port of betweenLoss: loss(outputs[-1], targets[-1])."""

    def __init__(self, gamma=(1, 1, 1, 1, 1, 1)):
        # gamma stored for parity with the PyTorch module; unused in forward,
        # exactly matching the reference implementation.
        self.gamma = gamma

    def __call__(self, outputs, targets):
        assert len(outputs)
        assert len(outputs) == len(targets)
        return l1_loss_pallas(outputs[-1], targets[-1])


if __name__ == "__main__":
    key = jax.random.PRNGKey(0)
    k1, k2, k3, k4 = jax.random.split(key, 4)

    # Small NCHW feature maps; two "stages" in each list (only the last is used).
    shape0 = (2, 4, 8, 8)    # earlier stage (ignored by forward)
    shape1 = (2, 4, 16, 16)  # last stage -> free (4, 512) lane-dense view
    outputs = [
        jax.random.normal(k1, shape0, dtype=jnp.float32),
        jax.random.normal(k2, shape1, dtype=jnp.float32),
    ]
    targets = [
        jax.random.normal(k3, shape0, dtype=jnp.float32),
        jax.random.normal(k4, shape1, dtype=jnp.float32),
    ]

    loss_mod = BetweenLossPallas(gamma=[1, 1, 1, 1, 1, 1])
    res = loss_mod(outputs, targets)
    res = jax.block_until_ready(res)

    # Cross-check against pure-JAX reference (exercises the masked tail path).
    ref = jnp.mean(jnp.abs(outputs[-1] - targets[-1]))
    assert jnp.allclose(res, ref, rtol=1e-5, atol=1e-5), (res, ref)

    # Extra check: size divisible by 128 but not 512 (cols=128 path).
    ka, kb = jax.random.split(k1)
    xa = jax.random.normal(ka, (2, 4, 4, 4), dtype=jnp.float32)   # 128 elements
    xb = jax.random.normal(kb, (2, 4, 4, 4), dtype=jnp.float32)
    r2 = jax.block_until_ready(l1_loss_pallas(xa, xb))
    assert jnp.allclose(r2, jnp.mean(jnp.abs(xa - xb)), rtol=1e-5, atol=1e-5)

    # Extra check: size not divisible by 128 (rare pad-fallback path).
    kc, kd = jax.random.split(k2)
    ya = jax.random.normal(kc, (2, 3, 5, 7), dtype=jnp.float32)   # 210 elements
    yb = jax.random.normal(kd, (2, 3, 5, 7), dtype=jnp.float32)
    r3 = jax.block_until_ready(l1_loss_pallas(ya, yb))
    assert jnp.allclose(r3, jnp.mean(jnp.abs(ya - yb)), rtol=1e-5, atol=1e-5)

    print("KERNEL_OK")
</pallas_src>

<mosaic_0001>
module attributes {stable_mosaic.version = 11 : i64} {
  func.func @kernel(%arg0: i32, %arg1: memref<32x512xf32, #tpu.memory_space<vmem>>, %arg2: memref<32x512xf32, #tpu.memory_space<vmem>>, %arg3: memref<8x512xf32, #tpu.memory_space<vmem>>) attributes {dimension_semantics = [#tpu.dimension_semantics<parallel>], iteration_bounds = array<i64: 1>, scalar_prefetch = 0 : i64, scratch_operands = 0 : i64, tpu.core_type = #tpu.core_type<tc>, window_params = [{transform_indices = @transform_0, window_bounds = array<i64: 32, 512>}, {transform_indices = @transform_1, window_bounds = array<i64: 32, 512>}, {transform_indices = @transform_2, window_bounds = array<i64: 8, 512>}]} {
    %c0_i32 = arith.constant 0 : i32
    %0 = arith.cmpi eq, %arg0, %c0_i32 : i32
    %true = arith.constant true
    %1 = arith.xori %0, %true : i1
    %2 = arith.extui %1 : i1 to i32
    %c0_i32_0 = arith.constant 0 : i32
    %3 = arith.cmpi ne, %2, %c0_i32_0 : i32
    scf.if %3 {
      %cst = arith.constant 0.000000e+00 : f32
      %6 = vector.broadcast %cst : f32 to vector<8x512xf32>
      %c0_i32_2 = arith.constant 0 : i32
      %c32_i32 = arith.constant 32 : i32
      %7 = arith.muli %c0_i32_2, %c32_i32 : i32
      %8 = tpu.assume_multiple %7, 32 : i32
      %9 = arith.index_cast %8 : i32 to index
      %c0 = arith.constant 0 : index
      %10 = vector.load %arg1[%9, %c0] : memref<32x512xf32, #tpu.memory_space<vmem>>, vector<32x512xf32>
      %11 = arith.index_cast %8 : i32 to index
      %c0_3 = arith.constant 0 : index
      %12 = vector.load %arg2[%11, %c0_3] : memref<32x512xf32, #tpu.memory_space<vmem>>, vector<32x512xf32>
      %13 = arith.subf %10, %12 : vector<32x512xf32>
      %14 = math.absf %13 : vector<32x512xf32>
      %15 = vector.extract_strided_slice %14 {offsets = [0, 0], sizes = [8, 512], strides = [1, 1]} : vector<32x512xf32> to vector<8x512xf32>
      %16 = arith.addf %6, %15 : vector<8x512xf32>
      %17 = vector.extract_strided_slice %14 {offsets = [8, 0], sizes = [8, 512], strides = [1, 1]} : vector<32x512xf32> to vector<8x512xf32>
      %18 = arith.addf %16, %17 : vector<8x512xf32>
      %19 = vector.extract_strided_slice %14 {offsets = [16, 0], sizes = [8, 512], strides = [1, 1]} : vector<32x512xf32> to vector<8x512xf32>
      %20 = arith.addf %18, %19 : vector<8x512xf32>
      %21 = vector.extract_strided_slice %14 {offsets = [24, 0], sizes = [8, 512], strides = [1, 1]} : vector<32x512xf32> to vector<8x512xf32>
      %22 = arith.addf %20, %21 : vector<8x512xf32>
      %c1_i32 = arith.constant 1 : i32
      %c0_4 = arith.constant 0 : index
      %c0_5 = arith.constant 0 : index
      %23 = vector.load %arg3[%c0_4, %c0_5] : memref<8x512xf32, #tpu.memory_space<vmem>>, vector<8x512xf32>
      tpu.vector_store %arg3[%c0_4, %c0_5], %22 {strides = array<i32>} : memref<8x512xf32, #tpu.memory_space<vmem>>, vector<8x512xf32>,
    } else {
    }
    %4 = arith.extui %0 : i1 to i32
    %c0_i32_1 = arith.constant 0 : i32
    %5 = arith.cmpi ne, %4, %c0_i32_1 : i32
    scf.if %5 {
      %cst = arith.constant 0.000000e+00 : f32
      %6 = vector.broadcast %cst : f32 to vector<8x512xf32>
      %c0_i32_2 = arith.constant 0 : i32
      %c32_i32 = arith.constant 32 : i32
      %7 = arith.muli %c0_i32_2, %c32_i32 : i32
      %8 = tpu.assume_multiple %7, 32 : i32
      %9 = arith.index_cast %8 : i32 to index
      %c0 = arith.constant 0 : index
      %10 = vector.load %arg1[%9, %c0] : memref<32x512xf32, #tpu.memory_space<vmem>>, vector<32x512xf32>
      %11 = arith.index_cast %8 : i32 to index
      %c0_3 = arith.constant 0 : index
      %12 = vector.load %arg2[%11, %c0_3] : memref<32x512xf32, #tpu.memory_space<vmem>>, vector<32x512xf32>
      %13 = arith.subf %10, %12 : vector<32x512xf32>
      %14 = math.absf %13 : vector<32x512xf32>
      %15 = tpu.iota {dimensions = array<i32: 0>} : vector<32x512xi32>
      %16 = vector.broadcast %8 : i32 to vector<32x512xi32>
      %17 = arith.addi %15, %16 : vector<32x512xi32>
      %c4_i32 = arith.constant 4 : i32
      %18 = vector.broadcast %c4_i32 : i32 to vector<32x512xi32>
      %19 = arith.cmpi slt, %17, %18 : vector<32x512xi32>
      %cst_4 = arith.constant 0.000000e+00 : f32
      %20 = vector.broadcast %cst_4 : f32 to vector<32x512xf32>
      %21 = arith.select %19, %14, %20 : vector<32x512xi1>, vector<32x512xf32>
      %22 = vector.extract_strided_slice %21 {offsets = [0, 0], sizes = [8, 512], strides = [1, 1]} : vector<32x512xf32> to vector<8x512xf32>
      %23 = arith.addf %6, %22 : vector<8x512xf32>
      %24 = vector.extract_strided_slice %21 {offsets = [8, 0], sizes = [8, 512], strides = [1, 1]} : vector<32x512xf32> to vector<8x512xf32>
      %25 = arith.addf %23, %24 : vector<8x512xf32>
      %26 = vector.extract_strided_slice %21 {offsets = [16, 0], sizes = [8, 512], strides = [1, 1]} : vector<32x512xf32> to vector<8x512xf32>
      %27 = arith.addf %25, %26 : vector<8x512xf32>
      %28 = vector.extract_strided_slice %21 {offsets = [24, 0], sizes = [8, 512], strides = [1, 1]} : vector<32x512xf32> to vector<8x512xf32>
      %29 = arith.addf %27, %28 : vector<8x512xf32>
      %c1_i32 = arith.constant 1 : i32
      %c0_5 = arith.constant 0 : index
      %c0_6 = arith.constant 0 : index
      %30 = vector.load %arg3[%c0_5, %c0_6] : memref<8x512xf32, #tpu.memory_space<vmem>>, vector<8x512xf32>
      tpu.vector_store %arg3[%c0_5, %c0_6], %29 {strides = array<i32>} : memref<8x512xf32, #tpu.memory_space<vmem>>, vector<8x512xf32>,
    } else {
    }
    return
  }
  func.func @transform_0(%arg0: i32) -> (i32, i32) {
    %c0_i32 = arith.constant 0 : i32
    %c0_i32_0 = arith.constant 0 : i32
    return %arg0, %c0_i32 : i32, i32
  }
  func.func @transform_1(%arg0: i32) -> (i32, i32) {
    %c0_i32 = arith.constant 0 : i32
    %c0_i32_0 = arith.constant 0 : i32
    return %arg0, %c0_i32 : i32, i32
  }
  func.func @transform_2(%arg0: i32) -> (i32, i32) {
    %c0_i32 = arith.constant 0 : i32
    %c0_i32_0 = arith.constant 0 : i32
    return %arg0, %c0_i32 : i32, i32
  }
}

</mosaic_0001>

<bundles_post_ra>
// kernel: tpu_custom_call.1
= control target key start
LH: loop header
LB: loop body
LE: loop exit
PB: predicated region body
PF: predicated region fallthrough
CT: control target
= control target key end

     0   :  { %7 = vsyncpa [#allocation3], 0  ;;  %s484_s0 = inlined_call_operand.hbm [shape: f32[4,512], index: 0, kind: input, shape index: {}]   ;;  %s485_s1 = inlined_call_operand.hbm [shape: f32[4,512], index: 1, kind: input, shape index: {}]   ;;  %s486_s2 = inlined_call_operand.hbm [shape: f32[8,512], index: 2, kind: output, shape index: {}]  }
   0x1   :  { %8 = vsyncpa [#allocation6], 0 }
   0x2   :  { %9 = vsyncpa [#allocation4], 0 }
   0x3   :  { %13 = vsyncadd [#allocation3], 1792  ;;  %s14_s11 = sshll.u32 %s484_s0, 4  ;;  %s451_s12 = smov [#allocation2]   ;;  %s15_s11 = int_to_ptr.hbm [resolvable:$true] %s14_s11 }
   0x4   :  { %s16_s13 = sshll.u32 %s451_s12, 4  ;;  %s452_s14 = smov 256   ;;  %s17_s13 = int_to_ptr.vmem [resolvable:$true] %s16_s13 }
   0x5   :  { %s453_s15 = smov 16  }
   0x6   :  { %22 = dma.hbm_to_vmem [thread:$0]  %s15_s11, 256, %s17_s13, [#allocation3], %s452_s14, %s452_s14, %s453_s15  }
   0x7   :  { %26 = vsyncadd [#allocation6], 1792  ;;  %s27_s18 = sshll.u32 %s485_s1, 4  ;;  %s454_s19 = smov [#allocation5]   ;;  %s28_s18 = int_to_ptr.hbm [resolvable:$true] %s27_s18 }
   0x8   :  { %s29_s20 = sshll.u32 %s454_s19, 4  ;;  %s30_s20 = int_to_ptr.vmem [resolvable:$true] %s29_s20 }
   0x9   :  { %35 = dma.hbm_to_vmem [thread:$0]  %s28_s18, 256, %s30_s20, [#allocation6], %s452_s14, %s452_s14, %s453_s15  }
   0xa   :  { %445 = dma.done.wait [#allocation3], 2048  }
   0xb   :  { %446 = vsyncadd [#allocation3], 4294965248 }
   0xc   :  { %447 = dma.done.wait [#allocation6], 2048  }
   0xd   :  { %448 = vsyncadd [#allocation6], 4294965248  ;;  %v229_v0 = vlaneseq  ;;  %v163_v1 = vld [vmem:[#allocation2] sm:$0xff]  ;;  %v165_v3 = vld [vmem:[#allocation2 + $0x10] sm:$0xff]  ;;  %s357_s21 = sshll.u32 %s486_s2, 4  ;;  %s455_s22 = smov [#allocation7]   ;;  %s358_s21 = int_to_ptr.hbm [resolvable:$true] %s357_s21 }
   0xe   :  { %v181_v2 = vld [vmem:[#allocation5] sm:$0xff]  ;;  %v183_v5 = vld [vmem:[#allocation5 + $0x10] sm:$0xff]  ;;  %v164_v6 = vld [vmem:[#allocation2 + $0x8] sm:$0xff]  ;;  %s355_s23 = sshll.u32 %s455_s22, 4  ;;  %s356_s23 = int_to_ptr.vmem [resolvable:$true] %s355_s23 }
   0xf   :  { %v197_v4 = vsub.f32 %v163_v1, %v181_v2  ;;  %v182_v7 = vld [vmem:[#allocation5 + $0x8] sm:$0xff]  ;;  %v199_v8 = vsub.f32 %v165_v3, %v183_v5  ;;  %v166_v10 = vld [vmem:[#allocation2 + $0x18] sm:$0xff]  ;;  %v230_v14 = vshrl.u32 %v229_v0, 7  ;;  %v171_v18 = vld [vmem:[#allocation2 + $0x40] sm:$0xff] }
  0x10   :  { %v198_v9 = vsub.f32 %v164_v6, %v182_v7  ;;  %v184_v11 = vld [vmem:[#allocation5 + $0x18] sm:$0xff]  ;;  %v189_v19 = vld [vmem:[#allocation5 + $0x40] sm:$0xff]  ;;  %v173_v21 = vld [vmem:[#allocation2 + $0x50] sm:$0xff] }
  0x11   :  { %v213_v12 = vand.u32 2147483647, %v197_v4  ;;  %v200_v13 = vsub.f32 %v166_v10, %v184_v11  ;;  %v215_v15 = vand.u32 2147483647, %v199_v8  ;;  %v205_v20 = vsub.f32 %v171_v18, %v189_v19  ;;  %v191_v22 = vld [vmem:[#allocation5 + $0x50] sm:$0xff]  ;;  %v172_v24 = vld [vmem:[#allocation2 + $0x48] sm:$0xff] }
  0x12   :  { %v214_v16 = vand.u32 2147483647, %v198_v9  ;;  %v207_v23 = vsub.f32 %v173_v21, %v191_v22  ;;  %v190_v25 = vld [vmem:[#allocation5 + $0x48] sm:$0xff]  ;;  %v174_v27 = vld [vmem:[#allocation2 + $0x58] sm:$0xff]  ;;  %vm239_vm0 = vcmp.lt.s32.totalorder %v230_v14, 4 }
  0x13   :  { %259 = vst [vmem:[#allocation1] ss:$2 sm:$0xff] %v213_v12  ;;  %v216_v17 = vand.u32 2147483647, %v200_v13  ;;  %v221_v26 = vand.u32 2147483647, %v205_v20  ;;  %v206_v29 = vsub.f32 %v172_v24, %v190_v25 }
  0x14   :  { %261 = vst [vmem:[#allocation1 + $0x1] ss:$2 sm:$0xff] %v215_v15  ;;  %v192_v28 = vld [vmem:[#allocation5 + $0x58] sm:$0xff]  ;;  %v223_v30 = vand.u32 2147483647, %v207_v23 }
  0x15   :  { %263 = vst [vmem:[#allocation1 + $0x10] ss:$2 sm:$0xff] %v214_v16  ;;  %v208_v33 = vsub.f32 %v174_v27, %v192_v28  ;;  %v222_v37 = vand.u32 2147483647, %v206_v29 }
  0x16   :  { %265 = vst [vmem:[#allocation1 + $0x11] ss:$2 sm:$0xff] %v216_v17 }
  0x17   :  { %v224_v41 = vand.u32 2147483647, %v208_v33 }
  0x1b   :  { %v274_v31 = vld.sshfl [vmem:[#allocation1] sm:$0xff pattern:$0x75316420]  ;;  %v275_v32 = vld.sshfl [vmem:[#allocation1 + $0x8] sm:$0xff pattern:$0x75316420] }
  0x1c   :  { %v314_v34 = vsel %vm239_vm0, %v274_v31, 0.0  ;;  %v315_v35 = vsel %vm239_vm0, %v275_v32, 0.0  ;;  %282 = vst [vmem:[#allocation1] ss:$2 sm:$0xff] %v221_v26 }
  0x1d   :  { %346 = vst [vmem:[#allocation7] sm:$0xff] %v314_v34  ;;  %v276_v36 = vld.sshfl [vmem:[#allocation1 + $0x10] sm:$0xff pattern:$0x75316420] }
  0x1e   :  { %347 = vst [vmem:[#allocation7 + $0x8] sm:$0xff] %v315_v35  ;;  %v316_v38 = vsel %vm239_vm0, %v276_v36, 0.0  ;;  %v277_v39 = vld.sshfl [vmem:[#allocation1 + $0x18] sm:$0xff pattern:$0x75316420] }
  0x1f   :  { %348 = vst [vmem:[#allocation7 + $0x10] sm:$0xff] %v316_v38  ;;  %v317_v40 = vsel %vm239_vm0, %v277_v39, 0.0 }
  0x20   :  { %349 = vst [vmem:[#allocation7 + $0x18] sm:$0xff] %v317_v40 }
  0x21   :  { %283 = vst [vmem:[#allocation1 + $0x1] ss:$2 sm:$0xff] %v223_v30  ;;  %360 = dma.vmem_to_hbm [thread:$0]  %s356_s23, 512, %s358_s21, [#allocation4]  }
  0x22   :  { %284 = vst [vmem:[#allocation1 + $0x10] ss:$2 sm:$0xff] %v222_v37 }
  0x23   :  { %285 = vst [vmem:[#allocation1 + $0x11] ss:$2 sm:$0xff] %v224_v41 }
  0x24   :  { %449 = dma.done.wait [#allocation4], 512  }
  0x25   :  { %450 = vsyncadd [#allocation4], 4294966784 }
  0x26   :  { %365 = vsyncpa [#allocation3], 1 }
  0x27   :  { %366 = vsyncpa [#allocation6], 1 }
  0x28   :  { %367 = vsyncpa [#allocation4], 1 }

</bundles_post_ra>
